<compile_context>
chip_gen: v5e
topology: v5e:2x2
jax: 0.10.0
libtpu: 0.0.40
codegen_flags: <defaults>
</compile_context>

<pallas_src>
import functools

import jax
import jax.numpy as jnp
from jax import lax
from jax.experimental import pallas as pl
from jax.experimental.pallas import tpu as pltpu


# Parameter-slab row offsets (all 8-aligned so every in-kernel slice starts on
# a sublane-tile boundary).
_R_W1 = 0      # (F_in, H*Fo + H)  layer-1 projection + folded alpha_dst cols
_R_A1 = 8      # (H, F_in)         layer-1 folded alpha_src rows
_R_B1 = 16     # (1, H*Fo)         layer-1 bias
_R_A2 = 24     # (1, H*Fo)         layer-2 folded alpha_src row
_R_B2 = 32     # (1, C)            layer-2 bias
_R_W2 = 40     # (H*Fo, C + 1)     layer-2 projection + folded alpha_dst col
# total slab rows = _R_W2 + H*Fo


def _gat_net_kernel(x_ref, adj_ref, slab_ref, out_ref, h1_ref, *,
                    n_feat, n_head, n_hid, n_class):
    """Fused 2-layer GAT forward (all heads, both layers, log_softmax)."""
    F_in, H, Fo, C = n_feat, n_head, n_hid, n_class
    HFo = H * Fo
    N = x_ref.shape[0]

    x = x_ref[...]                                              # (N, F_in) f32

    # Additive adjacency mask built in-kernel from the int8 adjacency
    # (convert + VPU select; shared by every head and both layers).
    adj_bias = jnp.where(adj_ref[...].astype(jnp.float32) > 0.0,
                         0.0, -1e30)                            # (N, N)

    # ---- parameter slab slices (one DMA'd input instead of six) ----
    w1e = slab_ref[_R_W1:_R_W1 + F_in, 0:HFo + H]               # (F_in, HFo+H)
    a1s = slab_ref[_R_A1:_R_A1 + H, 0:F_in]                     # (H, F_in)
    b1  = slab_ref[_R_B1:_R_B1 + 1, 0:HFo]                      # (1, HFo)
    a2s = slab_ref[_R_A2:_R_A2 + 1, 0:HFo]                      # (1, HFo)
    b2  = slab_ref[_R_B2:_R_B2 + 1, 0:C]                        # (1, C)
    w2e = slab_ref[_R_W2:_R_W2 + HFo, 0:C + 1]                  # (HFo, C+1)

    # ---------------- layer 1 (num_head heads, concat) ----------------
    # Single projection for all heads; alpha_dst folded in as the last H cols.
    proj1 = jnp.dot(x, w1e, preferred_element_type=jnp.float32)  # (N, HFo+H)
    # alpha_src for all heads at once: (H, N) via one small feature-contraction
    # (A @ x^T without an explicit transpose).
    asrc1 = lax.dot_general(a1s, x, (((1,), (1,)), ((), ())),
                            preferred_element_type=jnp.float32)  # (H, N)

    # Stack every head's attention logits on the sublane axis so the softmax
    # max / exp / sum run ONCE over (H*N, N) instead of H serialized chains.
    e_parts = []
    for h in range(H):                                           # static unroll
        e = proj1[:, HFo + h:HFo + h + 1] + asrc1[h:h + 1, :]    # (N, N)
        e = jnp.where(e > 0.0, e, 0.2 * e) + adj_bias            # LReLU(0.2)+mask
        e_parts.append(e)
    e_all = jnp.concatenate(e_parts, axis=0)                     # (H*N, N)
    m_all = jnp.max(e_all, axis=-1, keepdims=True)
    p_all = jnp.exp(e_all - m_all)                               # masked -> ~0
    d_all = jnp.sum(p_all, axis=-1, keepdims=True)               # (H*N, 1), >= 1
    rinv = pl.reciprocal(d_all, approx=False)    # exact: parity with torch

    # Per-head aggregation written straight into the lane slice of the h1
    # scratch (no lane-axis concatenate of 16-wide pieces).
    for h in range(H):
        o = jnp.dot(p_all[h * N:(h + 1) * N, :],
                    proj1[:, h * Fo:(h + 1) * Fo],
                    preferred_element_type=jnp.float32)          # (N, Fo)
        h1_ref[:, h * Fo:(h + 1) * Fo] = o * rinv[h * N:(h + 1) * N, :]

    h1 = h1_ref[...] + b1                                        # (N, HFo)
    h1 = jnp.where(h1 > 0.0, h1, 0.01 * h1)     # F.leaky_relu (slope 0.01)
    # TODO(synk): F.dropout(p=dropout) is stochastic in torch training mode;
    # treated as identity (eval mode) here.

    # ---------------- layer 2 (single head) ----------------
    proj2 = jnp.dot(h1, w2e, preferred_element_type=jnp.float32)  # (N, C+1)
    a2src = lax.dot_general(a2s, h1, (((1,), (1,)), ((), ())),
                            preferred_element_type=jnp.float32)   # (1, N)
    e2 = proj2[:, C:C + 1] + a2src
    e2 = jnp.where(e2 > 0.0, e2, 0.2 * e2) + adj_bias
    m2 = jnp.max(e2, axis=-1, keepdims=True)
    p2 = jnp.exp(e2 - m2)
    d2 = jnp.sum(p2, axis=-1, keepdims=True)
    logits = (jnp.dot(p2, proj2[:, :C], preferred_element_type=jnp.float32)
              * pl.reciprocal(d2, approx=False)) + b2             # (N, C)

    # ---------------- log_softmax(dim=1) ----------------
    z = logits - jnp.max(logits, axis=-1, keepdims=True)
    out_ref[...] = z - jnp.log(jnp.sum(jnp.exp(z), axis=-1, keepdims=True))


def fold_params(params):
    """Fold attention vectors into the projections and pack every parameter
    tensor into ONE sublane-aligned f32 slab (single DMA at kernel launch).
    Call once; the result is reused for every forward pass."""
    w1 = params["w1"]                              # (H, F_in, Fo)
    H, F_in, Fo = w1.shape
    w2 = params["w2"][0]                           # (H*Fo, C)
    C = w2.shape[-1]
    HFo = H * Fo

    # Heads concatenated on the lane axis; alpha_dst folded as extra columns
    # (<x W, a> == x (W a)) so it rides the same MXU pass as the projection.
    w1_all = jnp.transpose(w1, (1, 0, 2)).reshape(F_in, HFo)
    adst1 = jnp.einsum("hfo,ho->fh", w1, params["a1_dst"][:, 0, :])   # (F_in, H)
    w1_ext = jnp.concatenate([w1_all, adst1], axis=1)                 # (F_in, HFo+H)
    asrc1 = jnp.einsum("hfo,ho->hf", w1, params["a1_src"][:, 0, :])   # (H, F_in)

    adst2 = (w2 @ params["a2_dst"][0, 0])[:, None]                    # (HFo, 1)
    w2_ext = jnp.concatenate([w2, adst2], axis=1)                     # (HFo, C+1)
    asrc2 = (w2 @ params["a2_src"][0, 0])[None, :]                    # (1, HFo)

    width = HFo + H                                                   # widest piece
    slab = jnp.zeros((_R_W2 + HFo, width), jnp.float32)

    def put(s, r, a):
        return s.at[r:r + a.shape[0], 0:a.shape[1]].set(a)

    slab = put(slab, _R_W1, w1_ext)
    slab = put(slab, _R_A1, asrc1)
    slab = put(slab, _R_B1, params["b1"][None, :])
    slab = put(slab, _R_A2, asrc2)
    slab = put(slab, _R_B2, params["b2"][None, :])
    slab = put(slab, _R_W2, w2_ext)
    meta = dict(n_feat=F_in, n_head=H, n_hid=Fo, n_class=C)
    return slab, meta


def gat_net_forward(slab, x, adj_i8, *, n_feat, n_head, n_hid, n_class):
    """Full GAT_Net forward: one grid-less pallas_call, 3 DMA'd inputs."""
    N = x.shape[0]
    HFo = n_head * n_hid
    kernel = functools.partial(_gat_net_kernel, n_feat=n_feat, n_head=n_head,
                               n_hid=n_hid, n_class=n_class)
    vmem = pl.BlockSpec(memory_space=pltpu.MemorySpace.VMEM)
    # TODO(synk): for large graphs (N >~ 2K) or multi-graph batches, switch to
    # a row-tiled grid (flash-style online softmax over target-node blocks,
    # dimension_semantics=("parallel",) for v7x's 2 TCs) and bf16 MXU operands;
    # at N=16 the whole problem fits in a few vregs and that machinery only
    # adds launch overhead.
    return pl.pallas_call(
        kernel,
        out_shape=jax.ShapeDtypeStruct((N, n_class), jnp.float32),
        in_specs=[vmem, vmem, vmem],
        out_specs=vmem,
        scratch_shapes=[pltpu.VMEM((N, HFo), jnp.float32)],
    )(x, adj_i8, slab)


if __name__ == "__main__":
    key = jax.random.PRNGKey(0)
    N = 16                          # number of graph nodes
    input_dim, hidden_dim, num_class, num_head = 8, 16, 8, 4
    dropout = 0.5                   # unused at eval time (see TODO above)

    k = jax.random.split(key, 8)
    x = jax.random.normal(k[0], (N, input_dim), jnp.float32)

    # Random directed edge set as a dense mask; GATConv(add_self_loops=True)
    # => force the diagonal on.  adj[i, j] == 1 iff edge j -> i exists.
    adj = (jax.random.uniform(k[1], (N, N)) < 0.3).astype(jnp.float32)
    adj = jnp.maximum(adj, jnp.eye(N, dtype=jnp.float32))
    adj_i8 = adj.astype(jnp.int8)   # int8 adjacency; additive mask built in-kernel

    def glorot(kk, shape):
        fan = shape[-2] + shape[-1] if len(shape) >= 2 else shape[-1]
        return jax.random.normal(kk, shape, jnp.float32) * (2.0 / fan) ** 0.5

    params = dict(
        # gat1: in=input_dim, out=hidden_dim, heads=num_head (concat)
        w1=glorot(k[2], (num_head, input_dim, hidden_dim)),
        a1_src=glorot(k[3], (num_head, 1, hidden_dim)),
        a1_dst=glorot(k[4], (num_head, 1, hidden_dim)),
        b1=jnp.zeros((num_head * hidden_dim,), jnp.float32),
        # gat2: in=hidden_dim*num_head, out=num_class, heads=1
        w2=glorot(k[5], (1, num_head * hidden_dim, num_class)),
        a2_src=glorot(k[6], (1, 1, num_class)),
        a2_dst=glorot(k[7], (1, 1, num_class)),
        b2=jnp.zeros((num_class,), jnp.float32),
    )

    slab, meta = fold_params(params)     # param folding/packing done once
    fwd = jax.jit(functools.partial(gat_net_forward, **meta))
    out = jax.block_until_ready(fwd(slab, x, adj_i8))
    assert out.shape == (N, num_class), out.shape
    assert bool(jnp.all(jnp.isfinite(out)))
    print("KERNEL_OK")
</pallas_src>

<mosaic_0001>
module attributes {stable_mosaic.version = 11 : i64} {
  func.func @_gat_net_kernel(%arg0: memref<16x8xf32, #tpu.memory_space<vmem>>, %arg1: memref<16x16xi8, #tpu.memory_space<vmem>>, %arg2: memref<104x68xf32, #tpu.memory_space<vmem>>, %arg3: memref<16x8xf32, #tpu.memory_space<vmem>>, %arg4: memref<16x64xf32, #tpu.memory_space<vmem>>) attributes {dimension_semantics = [], scalar_prefetch = 0 : i64, scratch_operands = 1 : i64, tpu.core_type = #tpu.core_type<tc>} {
    %c0 = arith.constant 0 : index
    %c0_0 = arith.constant 0 : index
    %0 = vector.load %arg0[%c0, %c0_0] : memref<16x8xf32, #tpu.memory_space<vmem>>, vector<16x8xf32>
    %c0_1 = arith.constant 0 : index
    %c0_2 = arith.constant 0 : index
    %1 = vector.load %arg1[%c0_1, %c0_2] : memref<16x16xi8, #tpu.memory_space<vmem>>, vector<16x16xi8>
    %2 = arith.sitofp %1 : vector<16x16xi8> to vector<16x16xf32>
    %cst = arith.constant 0.000000e+00 : f32
    %3 = vector.broadcast %cst : f32 to vector<16x16xf32>
    %4 = arith.cmpf ogt, %2, %3 : vector<16x16xf32>
    %cst_3 = arith.constant 0.000000e+00 : f32
    %cst_4 = arith.constant -1.000000e+30 : f32
    %5 = vector.broadcast %cst_3 : f32 to vector<16x16xf32>
    %6 = vector.broadcast %cst_4 : f32 to vector<16x16xf32>
    %7 = arith.select %4, %5, %6 : vector<16x16xi1>, vector<16x16xf32>
    %c0_5 = arith.constant 0 : index
    %c0_6 = arith.constant 0 : index
    %8 = vector.load %arg2[%c0_5, %c0_6] : memref<104x68xf32, #tpu.memory_space<vmem>>, vector<8x68xf32>
    %c8 = arith.constant 8 : index
    %c0_7 = arith.constant 0 : index
    %9 = vector.load %arg2[%c8, %c0_7] : memref<104x68xf32, #tpu.memory_space<vmem>>, vector<4x8xf32>
    %c16 = arith.constant 16 : index
    %c0_8 = arith.constant 0 : index
    %10 = vector.load %arg2[%c16, %c0_8] : memref<104x68xf32, #tpu.memory_space<vmem>>, vector<1x64xf32>
    %c24 = arith.constant 24 : index
    %c0_9 = arith.constant 0 : index
    %11 = vector.load %arg2[%c24, %c0_9] : memref<104x68xf32, #tpu.memory_space<vmem>>, vector<1x64xf32>
    %c32 = arith.constant 32 : index
    %c0_10 = arith.constant 0 : index
    %12 = vector.load %arg2[%c32, %c0_10] : memref<104x68xf32, #tpu.memory_space<vmem>>, vector<1x8xf32>
    %c40 = arith.constant 40 : index
    %c0_11 = arith.constant 0 : index
    %13 = vector.load %arg2[%c40, %c0_11] : memref<104x68xf32, #tpu.memory_space<vmem>>, vector<64x9xf32>
    %cst_12 = arith.constant dense<0.000000e+00> : vector<16x68xf32>
    %14 = tpu.matmul %0, %8, %cst_12 {dimension_numbers = #tpu.dot_dimension_numbers<[1], [0], [0], [1], [0, 0, 1, 1], [], []>} : vector<16x8xf32>, vector<8x68xf32>, vector<16x68xf32> -> vector<16x68xf32>
    %cst_13 = arith.constant dense<0.000000e+00> : vector<4x16xf32>
    %15 = tpu.matmul %9, %0, %cst_13 {dimension_numbers = #tpu.dot_dimension_numbers<[1], [1], [0], [0], [0, 0, 1, 0], [], []>} : vector<4x8xf32>, vector<16x8xf32>, vector<4x16xf32> -> vector<4x16xf32>
    %16 = vector.extract_strided_slice %14 {offsets = [0, 64], sizes = [16, 1], strides = [1, 1]} : vector<16x68xf32> to vector<16x1xf32>
    %17 = vector.extract_strided_slice %15 {offsets = [0, 0], sizes = [1, 16], strides = [1, 1]} : vector<4x16xf32> to vector<1x16xf32>
    %18 = vector.broadcast %16 : vector<16x1xf32> to vector<16x16xf32>
    %19 = vector.broadcast %17 : vector<1x16xf32> to vector<16x16xf32>
    %20 = arith.addf %18, %19 : vector<16x16xf32>
    %cst_14 = arith.constant 0.000000e+00 : f32
    %21 = vector.broadcast %cst_14 : f32 to vector<16x16xf32>
    %22 = arith.cmpf ogt, %20, %21 : vector<16x16xf32>
    %cst_15 = arith.constant 2.000000e-01 : f32
    %23 = vector.broadcast %cst_15 : f32 to vector<16x16xf32>
    %24 = arith.mulf %23, %20 : vector<16x16xf32>
    %25 = arith.select %22, %20, %24 : vector<16x16xi1>, vector<16x16xf32>
    %26 = arith.addf %25, %7 : vector<16x16xf32>
    %27 = vector.extract_strided_slice %14 {offsets = [0, 65], sizes = [16, 1], strides = [1, 1]} : vector<16x68xf32> to vector<16x1xf32>
    %28 = vector.extract_strided_slice %15 {offsets = [1, 0], sizes = [1, 16], strides = [1, 1]} : vector<4x16xf32> to vector<1x16xf32>
    %29 = vector.broadcast %27 : vector<16x1xf32> to vector<16x16xf32>
    %30 = vector.broadcast %28 : vector<1x16xf32> to vector<16x16xf32>
    %31 = arith.addf %29, %30 : vector<16x16xf32>
    %cst_16 = arith.constant 0.000000e+00 : f32
    %32 = vector.broadcast %cst_16 : f32 to vector<16x16xf32>
    %33 = arith.cmpf ogt, %31, %32 : vector<16x16xf32>
    %cst_17 = arith.constant 2.000000e-01 : f32
    %34 = vector.broadcast %cst_17 : f32 to vector<16x16xf32>
    %35 = arith.mulf %34, %31 : vector<16x16xf32>
    %36 = arith.select %33, %31, %35 : vector<16x16xi1>, vector<16x16xf32>
    %37 = arith.addf %36, %7 : vector<16x16xf32>
    %38 = vector.extract_strided_slice %14 {offsets = [0, 66], sizes = [16, 1], strides = [1, 1]} : vector<16x68xf32> to vector<16x1xf32>
    %39 = vector.extract_strided_slice %15 {offsets = [2, 0], sizes = [1, 16], strides = [1, 1]} : vector<4x16xf32> to vector<1x16xf32>
    %40 = vector.broadcast %38 : vector<16x1xf32> to vector<16x16xf32>
    %41 = vector.broadcast %39 : vector<1x16xf32> to vector<16x16xf32>
    %42 = arith.addf %40, %41 : vector<16x16xf32>
    %cst_18 = arith.constant 0.000000e+00 : f32
    %43 = vector.broadcast %cst_18 : f32 to vector<16x16xf32>
    %44 = arith.cmpf ogt, %42, %43 : vector<16x16xf32>
    %cst_19 = arith.constant 2.000000e-01 : f32
    %45 = vector.broadcast %cst_19 : f32 to vector<16x16xf32>
    %46 = arith.mulf %45, %42 : vector<16x16xf32>
    %47 = arith.select %44, %42, %46 : vector<16x16xi1>, vector<16x16xf32>
    %48 = arith.addf %47, %7 : vector<16x16xf32>
    %49 = vector.extract_strided_slice %14 {offsets = [0, 67], sizes = [16, 1], strides = [1, 1]} : vector<16x68xf32> to vector<16x1xf32>
    %50 = vector.extract_strided_slice %15 {offsets = [3, 0], sizes = [1, 16], strides = [1, 1]} : vector<4x16xf32> to vector<1x16xf32>
    %51 = vector.broadcast %49 : vector<16x1xf32> to vector<16x16xf32>
    %52 = vector.broadcast %50 : vector<1x16xf32> to vector<16x16xf32>
    %53 = arith.addf %51, %52 : vector<16x16xf32>
    %cst_20 = arith.constant 0.000000e+00 : f32
    %54 = vector.broadcast %cst_20 : f32 to vector<16x16xf32>
    %55 = arith.cmpf ogt, %53, %54 : vector<16x16xf32>
    %cst_21 = arith.constant 2.000000e-01 : f32
    %56 = vector.broadcast %cst_21 : f32 to vector<16x16xf32>
    %57 = arith.mulf %56, %53 : vector<16x16xf32>
    %58 = arith.select %55, %53, %57 : vector<16x16xi1>, vector<16x16xf32>
    %59 = arith.addf %58, %7 : vector<16x16xf32>
    %60 = tpu.concatenate %26, %37, %48, %59 in 0 : vector<16x16xf32>, vector<16x16xf32>, vector<16x16xf32>, vector<16x16xf32> -> vector<64x16xf32>
    %cst_22 = arith.constant dense<0xFF800000> : vector<64xf32>
    %61 = vector.multi_reduction <maximumf>, %60, %cst_22 [1] : vector<64x16xf32> to vector<64xf32>
    %62 = vector.shape_cast %61 : vector<64xf32> to vector<64x1xf32>
    %63 = vector.broadcast %62 : vector<64x1xf32> to vector<64x16xf32>
    %64 = arith.subf %60, %63 : vector<64x16xf32>
    %65 = math.exp %64 : vector<64x16xf32>
    %cst_23 = arith.constant dense<0.000000e+00> : vector<64xf32>
    %66 = vector.multi_reduction <add>, %65, %cst_23 [1] : vector<64x16xf32> to vector<64xf32>
    %67 = vector.shape_cast %66 : vector<64xf32> to vector<64x1xf32>
    %68 = tpu.reciprocal %67 : vector<64x1xf32> -> vector<64x1xf32>
    %69 = vector.extract_strided_slice %65 {offsets = [0, 0], sizes = [16, 16], strides = [1, 1]} : vector<64x16xf32> to vector<16x16xf32>
    %70 = vector.extract_strided_slice %14 {offsets = [0, 0], sizes = [16, 16], strides = [1, 1]} : vector<16x68xf32> to vector<16x16xf32>
    %cst_24 = arith.constant dense<0.000000e+00> : vector<16x16xf32>
    %71 = tpu.matmul %69, %70, %cst_24 {dimension_numbers = #tpu.dot_dimension_numbers<[1], [0], [0], [1], [0, 0, 1, 1], [], []>} : vector<16x16xf32>, vector<16x16xf32>, vector<16x16xf32> -> vector<16x16xf32>
    %72 = vector.extract_strided_slice %68 {offsets = [0, 0], sizes = [16, 1], strides = [1, 1]} : vector<64x1xf32> to vector<16x1xf32>
    %73 = vector.broadcast %72 : vector<16x1xf32> to vector<16x16xf32>
    %74 = arith.mulf %71, %73 : vector<16x16xf32>
    %c0_25 = arith.constant 0 : index
    %c0_26 = arith.constant 0 : index
    %75 = vector.load %arg4[%c0_25, %c0_26] : memref<16x64xf32, #tpu.memory_space<vmem>>, vector<16x16xf32>
    tpu.vector_store %arg4[%c0_25, %c0_26], %74 {strides = array<i32>} : memref<16x64xf32, #tpu.memory_space<vmem>>, vector<16x16xf32>,
    %76 = vector.extract_strided_slice %65 {offsets = [16, 0], sizes = [16, 16], strides = [1, 1]} : vector<64x16xf32> to vector<16x16xf32>
    %77 = vector.extract_strided_slice %14 {offsets = [0, 16], sizes = [16, 16], strides = [1, 1]} : vector<16x68xf32> to vector<16x16xf32>
    %cst_27 = arith.constant dense<0.000000e+00> : vector<16x16xf32>
    %78 = tpu.matmul %76, %77, %cst_27 {dimension_numbers = #tpu.dot_dimension_numbers<[1], [0], [0], [1], [0, 0, 1, 1], [], []>} : vector<16x16xf32>, vector<16x16xf32>, vector<16x16xf32> -> vector<16x16xf32>
    %79 = vector.extract_strided_slice %68 {offsets = [16, 0], sizes = [16, 1], strides = [1, 1]} : vector<64x1xf32> to vector<16x1xf32>
    %80 = vector.broadcast %79 : vector<16x1xf32> to vector<16x16xf32>
    %81 = arith.mulf %78, %80 : vector<16x16xf32>
    %c0_28 = arith.constant 0 : index
    %c16_29 = arith.constant 16 : index
    %82 = vector.load %arg4[%c0_28, %c16_29] : memref<16x64xf32, #tpu.memory_space<vmem>>, vector<16x16xf32>
    tpu.vector_store %arg4[%c0_28, %c16_29], %81 {strides = array<i32>} : memref<16x64xf32, #tpu.memory_space<vmem>>, vector<16x16xf32>,
    %83 = vector.extract_strided_slice %65 {offsets = [32, 0], sizes = [16, 16], strides = [1, 1]} : vector<64x16xf32> to vector<16x16xf32>
    %84 = vector.extract_strided_slice %14 {offsets = [0, 32], sizes = [16, 16], strides = [1, 1]} : vector<16x68xf32> to vector<16x16xf32>
    %cst_30 = arith.constant dense<0.000000e+00> : vector<16x16xf32>
    %85 = tpu.matmul %83, %84, %cst_30 {dimension_numbers = #tpu.dot_dimension_numbers<[1], [0], [0], [1], [0, 0, 1, 1], [], []>} : vector<16x16xf32>, vector<16x16xf32>, vector<16x16xf32> -> vector<16x16xf32>
    %86 = vector.extract_strided_slice %68 {offsets = [32, 0], sizes = [16, 1], strides = [1, 1]} : vector<64x1xf32> to vector<16x1xf32>
    %87 = vector.broadcast %86 : vector<16x1xf32> to vector<16x16xf32>
    %88 = arith.mulf %85, %87 : vector<16x16xf32>
    %c0_31 = arith.constant 0 : index
    %c32_32 = arith.constant 32 : index
    %89 = vector.load %arg4[%c0_31, %c32_32] : memref<16x64xf32, #tpu.memory_space<vmem>>, vector<16x16xf32>
    tpu.vector_store %arg4[%c0_31, %c32_32], %88 {strides = array<i32>} : memref<16x64xf32, #tpu.memory_space<vmem>>, vector<16x16xf32>,
    %90 = vector.extract_strided_slice %65 {offsets = [48, 0], sizes = [16, 16], strides = [1, 1]} : vector<64x16xf32> to vector<16x16xf32>
    %91 = vector.extract_strided_slice %14 {offsets = [0, 48], sizes = [16, 16], strides = [1, 1]} : vector<16x68xf32> to vector<16x16xf32>
    %cst_33 = arith.constant dense<0.000000e+00> : vector<16x16xf32>
    %92 = tpu.matmul %90, %91, %cst_33 {dimension_numbers = #tpu.dot_dimension_numbers<[1], [0], [0], [1], [0, 0, 1, 1], [], []>} : vector<16x16xf32>, vector<16x16xf32>, vector<16x16xf32> -> vector<16x16xf32>
    %93 = vector.extract_strided_slice %68 {offsets = [48, 0], sizes = [16, 1], strides = [1, 1]} : vector<64x1xf32> to vector<16x1xf32>
    %94 = vector.broadcast %93 : vector<16x1xf32> to vector<16x16xf32>
    %95 = arith.mulf %92, %94 : vector<16x16xf32>
    %c0_34 = arith.constant 0 : index
    %c48 = arith.constant 48 : index
    %96 = vector.load %arg4[%c0_34, %c48] : memref<16x64xf32, #tpu.memory_space<vmem>>, vector<16x16xf32>
    tpu.vector_store %arg4[%c0_34, %c48], %95 {strides = array<i32>} : memref<16x64xf32, #tpu.memory_space<vmem>>, vector<16x16xf32>,
    %c0_35 = arith.constant 0 : index
    %c0_36 = arith.constant 0 : index
    %97 = vector.load %arg4[%c0_35, %c0_36] : memref<16x64xf32, #tpu.memory_space<vmem>>, vector<16x64xf32>
    %98 = vector.broadcast %10 : vector<1x64xf32> to vector<16x64xf32>
    %99 = arith.addf %97, %98 : vector<16x64xf32>
    %cst_37 = arith.constant 0.000000e+00 : f32
    %100 = vector.broadcast %cst_37 : f32 to vector<16x64xf32>
    %101 = arith.cmpf ogt, %99, %100 : vector<16x64xf32>
    %cst_38 = arith.constant 0.00999999977 : f32
    %102 = vector.broadcast %cst_38 : f32 to vector<16x64xf32>
    %103 = arith.mulf %102, %99 : vector<16x64xf32>
    %104 = arith.select %101, %99, %103 : vector<16x64xi1>, vector<16x64xf32>
    %cst_39 = arith.constant dense<0.000000e+00> : vector<16x9xf32>
    %105 = tpu.matmul %104, %13, %cst_39 {dimension_numbers = #tpu.dot_dimension_numbers<[1], [0], [0], [1], [0, 0, 1, 1], [], []>} : vector<16x64xf32>, vector<64x9xf32>, vector<16x9xf32> -> vector<16x9xf32>
    %cst_40 = arith.constant dense<0.000000e+00> : vector<1x16xf32>
    %106 = tpu.matmul %11, %104, %cst_40 {dimension_numbers = #tpu.dot_dimension_numbers<[1], [1], [0], [0], [0, 0, 1, 0], [], []>} : vector<1x64xf32>, vector<16x64xf32>, vector<1x16xf32> -> vector<1x16xf32>
    %107 = vector.extract_strided_slice %105 {offsets = [0, 8], sizes = [16, 1], strides = [1, 1]} : vector<16x9xf32> to vector<16x1xf32>
    %108 = vector.broadcast %107 : vector<16x1xf32> to vector<16x16xf32>
    %109 = vector.broadcast %106 : vector<1x16xf32> to vector<16x16xf32>
    %110 = arith.addf %108, %109 : vector<16x16xf32>
    %cst_41 = arith.constant 0.000000e+00 : f32
    %111 = vector.broadcast %cst_41 : f32 to vector<16x16xf32>
    %112 = arith.cmpf ogt, %110, %111 : vector<16x16xf32>
    %cst_42 = arith.constant 2.000000e-01 : f32
    %113 = vector.broadcast %cst_42 : f32 to vector<16x16xf32>
    %114 = arith.mulf %113, %110 : vector<16x16xf32>
    %115 = arith.select %112, %110, %114 : vector<16x16xi1>, vector<16x16xf32>
    %116 = arith.addf %115, %7 : vector<16x16xf32>
    %cst_43 = arith.constant dense<0xFF800000> : vector<16xf32>
    %117 = vector.multi_reduction <maximumf>, %116, %cst_43 [1] : vector<16x16xf32> to vector<16xf32>
    %118 = vector.shape_cast %117 : vector<16xf32> to vector<16x1xf32>
    %119 = vector.broadcast %118 : vector<16x1xf32> to vector<16x16xf32>
    %120 = arith.subf %116, %119 : vector<16x16xf32>
    %121 = math.exp %120 : vector<16x16xf32>
    %cst_44 = arith.constant dense<0.000000e+00> : vector<16xf32>
    %122 = vector.multi_reduction <add>, %121, %cst_44 [1] : vector<16x16xf32> to vector<16xf32>
    %123 = vector.shape_cast %122 : vector<16xf32> to vector<16x1xf32>
    %124 = vector.extract_strided_slice %105 {offsets = [0, 0], sizes = [16, 8], strides = [1, 1]} : vector<16x9xf32> to vector<16x8xf32>
    %cst_45 = arith.constant dense<0.000000e+00> : vector<16x8xf32>
    %125 = tpu.matmul %121, %124, %cst_45 {dimension_numbers = #tpu.dot_dimension_numbers<[1], [0], [0], [1], [0, 0, 1, 1], [], []>} : vector<16x16xf32>, vector<16x8xf32>, vector<16x8xf32> -> vector<16x8xf32>
    %126 = tpu.reciprocal %123 : vector<16x1xf32> -> vector<16x1xf32>
    %127 = vector.broadcast %126 : vector<16x1xf32> to vector<16x8xf32>
    %128 = arith.mulf %125, %127 : vector<16x8xf32>
    %129 = vector.broadcast %12 : vector<1x8xf32> to vector<16x8xf32>
    %130 = arith.addf %128, %129 : vector<16x8xf32>
    %cst_46 = arith.constant dense<0xFF800000> : vector<16xf32>
    %131 = vector.multi_reduction <maximumf>, %130, %cst_46 [1] : vector<16x8xf32> to vector<16xf32>
    %132 = vector.shape_cast %131 : vector<16xf32> to vector<16x1xf32>
    %133 = vector.broadcast %132 : vector<16x1xf32> to vector<16x8xf32>
    %134 = arith.subf %130, %133 : vector<16x8xf32>
    %135 = math.exp %134 : vector<16x8xf32>
    %cst_47 = arith.constant dense<0.000000e+00> : vector<16xf32>
    %136 = vector.multi_reduction <add>, %135, %cst_47 [1] : vector<16x8xf32> to vector<16xf32>
    %137 = vector.shape_cast %136 : vector<16xf32> to vector<16x1xf32>
    %138 = math.log %137 : vector<16x1xf32>
    %139 = vector.broadcast %138 : vector<16x1xf32> to vector<16x8xf32>
    %140 = arith.subf %134, %139 : vector<16x8xf32>
    %c0_48 = arith.constant 0 : index
    %c0_49 = arith.constant 0 : index
    %141 = vector.load %arg3[%c0_48, %c0_49] : memref<16x8xf32, #tpu.memory_space<vmem>>, vector<16x8xf32>
    tpu.vector_store %arg3[%c0_48, %c0_49], %140 {strides = array<i32>} : memref<16x8xf32, #tpu.memory_space<vmem>>, vector<16x8xf32>,
    return
  }
}

</mosaic_0001>

<bundles_post_ra>
// kernel: gat_net_forward.1
= control target key start
LH: loop header
LB: loop body
LE: loop exit
PB: predicated region body
PF: predicated region fallthrough
CT: control target
= control target key end

     0   :  { %vm39_vm0 = vcmask 64512   ;;  %v840_v3 = vmov 67   ;;  %v841_v4 = vmov 65   ;;  %v842_v6 = vmov 66   ;;  %s846_s21 = smov 96   ;;  %s847_s22 = smov 80   ;;  %s1070_s2 = inlined_call_operand.vmem [shape: f32[104,68], index: 2, kind: input, shape index: {}]   ;;  %s1071_s0 = inlined_call_operand.vmem [shape: f32[16,8], index: 0, kind: input, shape index: {}]   ;;  %s1072_s1 = inlined_call_operand.vmem [shape: s8[16,16], index: 1, kind: input, shape index: {}]   ;;  %s1073_s3 = inlined_call_operand.vmem [shape: f32[16,8], index: 3, kind: output, shape index: {}]  }
   0x1   :  { %v26_v0 = vld [vmem:[%s1070_s2] sm:$0xff]  ;;  %v15_v2 = vld [vmem:[%s1071_s0 + $0x8] sm:$0xff]  ;;  %767 = vset.pattern.permute.xlu1 %v840_v3  ;;  %765 = vset.pattern.permute.xlu0 %v841_v4  ;;  %v843_v9 = vmov 64   ;;  %v844_v20 = vmov -1e+30   ;;  %vm170_vm4 = vcmask 130048  }
   0x2   :  { %v14_v1 = vld [vmem:[%s1071_s0] sm:$0xff]  ;;  %61 = vmatpush.msra.mxu0 %v26_v0  ;;  %729 = vmatpush.xpose.msk.msra.mxu1 %vm39_vm0, %v15_v2  ;;  %v27_v5 = vld [vmem:[%s1070_s2 + $0x8] sm:$0xf]  ;;  %s848_s23 = smov 16   ;;  %s849_s24 = smov 48  }
   0x3   :  { %727 = vmatmul.msk.f32.vlgmr.msra.gmra.mxu0 %vm39_vm0, %v14_v1  ;;  %770 = vset.pattern.permute.xlu2 %v842_v6  ;;  %v748_v10 = vld [vmem:[%s1072_s1] sm:$0xf]   ;;  %s845_s1 = smov 112   ;;  %s850_s25 = smov 32  }
   0x4   :  { %v749_v11 = vunpack.c.0.s8 %v748_v10  ;;  %v750_v31 = vunpack.c.1.s8 %v748_v10 }
   0x6   :  { %730 = vmatpush.xpose.msk.msra.mxu1 %vm39_vm0, %v14_v1  ;;  %v20_v13 = vcvt.s32.f32 %v749_v11  ;;  %v21_v37 = vcvt.s32.f32 %v750_v31 }
   0x8   :  { %vm22_vm1 = vcmp.gt.f32.partialorder %v20_v13, 0.0  ;;  %vm23_vm6 = vcmp.gt.f32.partialorder %v21_v37, 0.0 }
   0x9   :  { %731 = vmatmul.msk.f32.vlgmr.msra.gmra.mxu1 %vm39_vm0, %v27_v5  ;;  %v910_v21 = vsel %vm22_vm1, 0.0, %v844_v20  ;;  %v925_v45 = vsel %vm23_vm6, 0.0, %v844_v20 }
   0xb   :  { %728 = vmatmul.msk.f32.gmra.mxu0 %vm39_vm0, %v15_v2 }
  0x80   :  { %v889_v7 = vpop.f32.mrf.mxu0 }
  0x81   :  { %152 = vperm.xlu1 %767, %v889_v7   ;;  %114 = vperm.xlu0 %765, %v889_v7  }
  0x86   :  { %v906_v12 = vpop.f32.mrf.mxu1 }
  0x87   :  { %v159_v14 = vperm.slane %v906_v12, 3  ;;  %v121_v15 = vperm.slane %v906_v12, 1  ;;  %v140_v28 = vperm.slane %v906_v12, 2  ;;  %v102_v60 = vperm.slane %v906_v12, 0 }
  0x88   :  { %v893_v8 = vpop.f32.mrf.mxu0 }
  0x89   :  { %768 = vset.pattern.permute.xlu1 %v843_v9  ;;  %766 = vset.pattern.permute.xlu0 %v842_v6  ;;  %v773_v56 = vpack.i.bf16 %v889_v7, %v893_v8 }
  0x8a   :  { %137 = vperm.xlu2 %770, %v893_v8   ;;  %375 = vmatpush.msra.mxu2 %v893_v8 }
  0x8b   :  { %94 = vperm.xlu1 %768, %v889_v7   ;;  %133 = vperm.xlu0 %766, %v889_v7  }
  0x8c   :  { %376 = vmatpush.msra.mxu2 %v889_v7 }
  0x92   :  { %771 = vset.pattern.permute.xlu2 %v840_v3 }
  0x93   :  { %769 = vset.pattern.permute.xlu1 %v841_v4  ;;  %156 = vperm.xlu2 %771, %v893_v8  }
  0x94   :  { %118 = vperm.xlu1 %769, %v893_v8  }
  0x9b   :  { %772 = vset.pattern.permute.xlu2 %v843_v9 }
  0x9c   :  { %99 = vperm.xlu2 %772, %v893_v8  }
  0xe4   :  { %v138_v32 = vpop.permute.xlu2 %137 }
  0xe5   :  { %v142_v36 = vadd.f32 %v140_v28, %v138_v32 }
  0xe7   :  { %v146_v40 = vmul.f32 0.2, %v142_v36  ;;  %vm144_vm7 = vcmp.gt.f32.partialorder %v142_v36, 0.0 }
  0xe9   :  { %v148_v46 = vsel %vm144_vm7, %v142_v36, %v146_v40 }
  0xea   :  { %v928_v50 = vadd.f32 %v148_v46, %v925_v45 }
  0xec   :  { %v186_v54 = vsel %vm170_vm4, %v928_v50, -inf }
  0xed   :  { %v157_v43 = vpop.permute.xlu2 %156 }
  0xee   :  { %v161_v47 = vadd.f32 %v159_v14, %v157_v43 }
  0xf0   :  { %v165_v51 = vmul.f32 0.2, %v161_v47  ;;  %vm163_vm9 = vcmp.gt.f32.partialorder %v161_v47, 0.0 }
  0xf2   :  { %v167_v57 = vsel %vm163_vm9, %v161_v47, %v165_v51 }
  0xf3   :  { %v153_v16 = vpop.permute.xlu1 %152  ;;  %v115_v17 = vpop.permute.xlu0 %114  ;;  %v169_v58 = vadd.f32 %v167_v57, %v925_v45 }
  0xf4   :  { %v160_v18 = vadd.f32 %v159_v14, %v153_v16  ;;  %v122_v19 = vadd.f32 %v121_v15, %v115_v17 }
  0xf5   :  { %v192_v59 = vsel %vm170_vm4, %v169_v58, -inf }
  0xf6   :  { %vm162_vm2 = vcmp.gt.f32.partialorder %v160_v18, 0.0  ;;  %v164_v22 = vmul.f32 0.2, %v160_v18  ;;  %vm124_vm3 = vcmp.gt.f32.partialorder %v122_v19, 0.0  ;;  %v126_v23 = vmul.f32 0.2, %v122_v19  ;;  %v100_v2 = vpop.permute.xlu2 %99 }
  0xf7   :  { %v104_v3 = vadd.f32 %v102_v60, %v100_v2 }
  0xf8   :  { %v128_v24 = vsel %vm124_vm3, %v122_v19, %v126_v23  ;;  %v166_v25 = vsel %vm162_vm2, %v160_v18, %v164_v22 }
  0xf9   :  { %v913_v26 = vadd.f32 %v128_v24, %v910_v21  ;;  %v916_v27 = vadd.f32 %v166_v25, %v910_v21  ;;  %v108_v4 = vmul.f32 0.2, %v104_v3  ;;  %vm106_vm11 = vcmp.gt.f32.partialorder %v104_v3, 0.0 }
  0xfb   :  { %v177_v29 = vsel %vm170_vm4, %v913_v26, -inf  ;;  %v189_v30 = vsel %vm170_vm4, %v916_v27, -inf  ;;  %v110_v5 = vsel %vm106_vm11, %v104_v3, %v108_v4 }
  0xfc   :  { %178 = vmax.xlane.f32.xlu0 %v177_v29  ;;  %190 = vmax.xlane.f32.xlu2 %v189_v30  ;;  %v945_v6 = vadd.f32 %v110_v5, %v925_v45 }
  0xfd   :  { %v95_v33 = vpop.permute.xlu1 %94  ;;  %v134_v34 = vpop.permute.xlu0 %133 }
  0xfe   :  { %v141_v35 = vadd.f32 %v140_v28, %v134_v34  ;;  %v103_v61 = vadd.f32 %v102_v60, %v95_v33  ;;  %v174_v7 = vsel %vm170_vm4, %v945_v6, -inf }
 0x100   :  { %vm143_vm5 = vcmp.gt.f32.partialorder %v141_v35, 0.0  ;;  %v145_v38 = vmul.f32 0.2, %v141_v35  ;;  %v107_v62 = vmul.f32 0.2, %v103_v61  ;;  %vm105_vm10 = vcmp.gt.f32.partialorder %v103_v61, 0.0 }
 0x102   :  { %v147_v39 = vsel %vm143_vm5, %v141_v35, %v145_v38  ;;  %v109_v63 = vsel %vm105_vm10, %v103_v61, %v107_v62 }
 0x103   :  { %v149_v41 = vadd.f32 %v147_v39, %v910_v21  ;;  %v940_v0 = vadd.f32 %v109_v63, %v910_v21 }
 0x105   :  { %v183_v42 = vsel %vm170_vm4, %v149_v41, -inf  ;;  %v171_v1 = vsel %vm170_vm4, %v940_v0, -inf }
 0x106   :  { %184 = vmax.xlane.f32.xlu1 %v183_v42  ;;  %v119_v44 = vpop.permute.xlu1 %118 }
 0x107   :  { %v123_v48 = vadd.f32 %v121_v15, %v119_v44 }
 0x109   :  { %vm125_vm8 = vcmp.gt.f32.partialorder %v123_v48, 0.0  ;;  %v127_v49 = vmul.f32 0.2, %v123_v48 }
 0x10b   :  { %v129_v52 = vsel %vm125_vm8, %v123_v48, %v127_v49 }
 0x10c   :  { %v131_v53 = vadd.f32 %v129_v52, %v925_v45 }
 0x10e   :  { %187 = vmax.xlane.f32.xlu1 %v186_v54  ;;  %v180_v55 = vsel %vm170_vm4, %v131_v53, -inf }
 0x10f   :  { %181 = vmax.xlane.f32.xlu2 %v180_v55 }
 0x110   :  { %774 = vrot.lane.b32.xlu0 %v773_v56, %s845_s1 }
 0x117   :  { %193 = vmax.xlane.f32.xlu2 %v192_v59 }
 0x127   :  { %779 = vrot.lane.b32.xlu1 %v773_v56, %s846_s21 }
 0x12f   :  { %784 = vrot.lane.b32.xlu2 %v773_v56, %s847_s22 }
 0x13a   :  { %172 = vmax.xlane.f32.xlu0 %v171_v1 }
 0x151   :  { %175 = vmax.xlane.f32.xlu1 %v174_v7 }
 0x16f   :  { %v179_v8 = vpop.xlane.xlu0 %178  ;;  %v191_v11 = vpop.xlane.xlu2 %190 }
 0x170   :  { %v197_v9 = vsub.f32 %v913_v26, %v179_v8  ;;  %v201_v16 = vsub.f32 %v916_v27, %v191_v11 }
 0x172   :  { %v207_v10 = vmul.f32 1.442695, %v197_v9  ;;  %v215_v18 = vmul.f32 1.442695, %v201_v16 }
 0x174   :  { %792 = vpow2.f32 %v207_v10 }
 0x179   :  { %v185_v12 = vpop.xlane.xlu1 %184 }
 0x17a   :  { %v793_v13 = vpop.eup %792  ;;  %v199_v14 = vsub.f32 %v149_v41, %v185_v12 }
 0x17b   :  { %v225_v15 = vsel %vm170_vm4, %v793_v13, 0.0 }
 0x17c   :  { %v211_v17 = vmul.f32 1.442695, %v199_v14  ;;  %226 = vadd.xlane.f32.xlu2 %v225_v15 }
 0x17e   :  { %794 = vpow2.f32 %v211_v17 }
 0x17f   :  { %796 = vpow2.f32 %v215_v18 }
 0x181   :  { %v188_v19 = vpop.xlane.xlu1 %187 }
 0x182   :  { %v182_v20 = vpop.xlane.xlu2 %181  ;;  %v775_v22 = vpop.permute.xlu0 %774  ;;  %v200_v26 = vsub.f32 %v928_v50, %v188_v19 }
 0x183   :  { %v198_v23 = vsub.f32 %v131_v53, %v182_v20  ;;  %v776_v24 = vunpack.i.l.bf16 %v775_v22  ;;  %v777_v30 = vunpack.i.h.bf16 %v775_v22 }
 0x184   :  { %v795_v25 = vpop.eup %794  ;;  %v213_v27 = vmul.f32 1.442695, %v200_v26 }
 0x185   :  { %v209_v28 = vmul.f32 1.442695, %v198_v23  ;;  %414 = vmatpush.msrb.mxu1 %v776_v24  ;;  %751 = vmatpush.msra.mxu3 %v776_v24  ;;  %v231_v29 = vsel %vm170_vm4, %v795_v25, 0.0  ;;  %v797_v31 = vpop.eup %796 }
 0x186   :  { %232 = vadd.xlane.f32.xlu0 %v231_v29  ;;  %v237_v36 = vsel %vm170_vm4, %v797_v31, 0.0 }
 0x187   :  { %798 = vpow2.f32 %v209_v28  ;;  %415 = vmatpush.msrb.mxu1 %v777_v30  ;;  %752 = vmatpush.msra.mxu3 %v777_v30 }
 0x188   :  { %734 = vmatmul.msk.f32.vlgmr.msrb.gmra.mxu1 %vm170_vm4, %v793_v13  ;;  %800 = vpow2.f32 %v213_v27 }
 0x18a   :  { %v194_v32 = vpop.xlane.xlu2 %193 }
 0x18b   :  { %v202_v33 = vsub.f32 %v169_v58, %v194_v32 }
 0x18d   :  { %v799_v34 = vpop.eup %798  ;;  %v217_v35 = vmul.f32 1.442695, %v202_v33 }
 0x18e   :  { %735 = vmatmul.msk.f32.vlgmr.msra.gmra.mxu3 %vm170_vm4, %v799_v34  ;;  %238 = vadd.xlane.f32.xlu0 %v237_v36  ;;  %v228_v37 = vsel %vm170_vm4, %v799_v34, 0.0  ;;  %v801_v38 = vpop.eup %800 }
 0x18f   :  { %802 = vpow2.f32 %v217_v35  ;;  %229 = vadd.xlane.f32.xlu1 %v228_v37  ;;  %v234_v42 = vsel %vm170_vm4, %v801_v38, 0.0 }
 0x192   :  { %v785_v39 = vpop.permute.xlu2 %784 }
 0x193   :  { %v786_v40 = vunpack.i.l.bf16 %v785_v39  ;;  %v787_v43 = vunpack.i.h.bf16 %v785_v39 }
 0x195   :  { %v803_v41 = vpop.eup %802  ;;  %510 = vmatpush.msrb.mxu0 %v786_v40 }
 0x196   :  { %235 = vadd.xlane.f32.xlu0 %v234_v42  ;;  %v240_v44 = vsel %vm170_vm4, %v803_v41, 0.0 }
 0x197   :  { %241 = vadd.xlane.f32.xlu2 %v240_v44  ;;  %511 = vmatpush.msrb.mxu0 %v787_v43 }
 0x198   :  { %738 = vmatmul.msk.f32.vlgmr.msrb.gmra.mxu0 %vm170_vm4, %v797_v31 }
 0x199   :  { %v780_v46 = vpop.permute.xlu1 %779 }
 0x19a   :  { %v781_v47 = vunpack.i.l.bf16 %v780_v46  ;;  %v782_v48 = vunpack.i.h.bf16 %v780_v46 }
 0x19c   :  { %462 = vmatpush.msra.mxu1 %v781_v47 }
 0x19e   :  { %463 = vmatpush.msra.mxu1 %v782_v48 }
 0x19f   :  { %736 = vmatmul.msk.f32.vlgmr.msra.gmra.mxu1 %vm170_vm4, %v795_v25 }
 0x1a0   :  { %739 = vmatmul.msk.f32.gmra.mxu0 %vm170_vm4, %v803_v41 }
 0x1a7   :  { %737 = vmatmul.msk.f32.gmra.mxu1 %vm170_vm4, %v801_v38 }
 0x1ad   :  { %v173_v49 = vpop.xlane.xlu0 %172 }
 0x1ae   :  { %v195_v50 = vsub.f32 %v940_v0, %v173_v49 }
 0x1b0   :  { %v203_v51 = vmul.f32 1.442695, %v195_v50 }
 0x1b2   :  { %804 = vpow2.f32 %v203_v51 }
 0x1b8   :  { %v805_v52 = vpop.eup %804 }
 0x1b9   :  { %732 = vmatmul.msk.f32.vlgmr.msra.gmra.mxu2 %vm170_vm4, %v805_v52  ;;  %v219_v53 = vsel %vm170_vm4, %v805_v52, 0.0 }
 0x1ba   :  { %220 = vadd.xlane.f32.xlu1 %v219_v53 }
 0x1c4   :  { %v176_v54 = vpop.xlane.xlu1 %175 }
 0x1c5   :  { %v196_v55 = vsub.f32 %v945_v6, %v176_v54 }
 0x1c7   :  { %v205_v56 = vmul.f32 1.442695, %v196_v55 }
 0x1c9   :  { %806 = vpow2.f32 %v205_v56 }
 0x1cf   :  { %v807_v57 = vpop.eup %806 }
 0x1d0   :  { %733 = vmatmul.msk.f32.gmra.mxu2 %vm170_vm4, %v807_v57  ;;  %v222_v58 = vsel %vm170_vm4, %v807_v57, 0.0 }
 0x1d1   :  { %223 = vadd.xlane.f32.xlu0 %v222_v58 }
 0x1ef   :  { %v227_v59 = vpop.xlane.xlu2 %226 }
 0x1f0   :  { %808 = vrcp.f32 %v227_v59  ;;  %v282_v2 = vand.u32 2147483648, %v227_v59  ;;  %vm276_vm13 = vweird.f32 %v227_v59  ;;  %v280_v3 = vand.u32 2147483647, %v227_v59 }
 0x1f2   :  { %v283_v7 = vor.u32 1.1754944e-38, %v282_v2  ;;  %vm281_vm15 = vcmp.eq.f32.partialorder %v280_v3, 8.507059e+37 }
 0x1f6   :  { %v809_v60 = vpop.eup %808 }
 0x1f7   :  { %v272_v61 = vmul.f32 %v809_v60, %v227_v59  ;;  %vm277_vm12 = vweird.f32 %v809_v60 }
 0x1f8   :  { %vm278_vm14 = vmor %vm276_vm13, %vm277_vm12 }
 0x1f9   :  { %v273_v62 = vsub.f32 1.0, %v272_v61  ;;  %v970_v63 = vpop.xlane.xlu0 %232 }
 0x1fa   :  { %810 = vrcp.f32 %v970_v63  ;;  %v310_v51 = vand.u32 2147483648, %v970_v63  ;;  %vm304_vm11 = vweird.f32 %v970_v63  ;;  %v308_v52 = vand.u32 2147483647, %v970_v63 }
 0x1fb   :  { %v274_v0 = vmul.f32 %v809_v60, %v273_v62 }
 0x1fc   :  { %v311_v56 = vor.u32 1.1754944e-38, %v310_v51  ;;  %vm309_vm13 = vcmp.eq.f32.partialorder %v308_v52, 8.507059e+37 }
 0x1fd   :  { %v275_v1 = vadd.f32 %v809_v60, %v274_v0 }
 0x1ff   :  { %v279_v6 = vsel %vm278_vm14, %v809_v60, %v275_v1 }
 0x200   :  { %v284_v8 = vsel %vm281_vm15, %v283_v7, %v279_v6  ;;  %v973_v10 = vpop.eup %810 }
 0x201   :  { %v239_v4 = vpop.xlane.xlu0 %238  ;;  %v300_v14 = vmul.f32 %v973_v10, %v970_v63  ;;  %vm305_vm10 = vweird.f32 %v973_v10 }
 0x202   :  { %812 = vrcp.f32 %v239_v4  ;;  %v230_v5 = vpop.xlane.xlu1 %229  ;;  %vm332_vm3 = vweird.f32 %v239_v4  ;;  %v338_v29 = vand.u32 2147483648, %v239_v4  ;;  %v336_v32 = vand.u32 2147483647, %v239_v4  ;;  %vm306_vm12 = vmor %vm304_vm11, %vm305_vm10 }
 0x203   :  { %814 = vrcp.f32 %v230_v5  ;;  %v301_v22 = vsub.f32 1.0, %v300_v14  ;;  %v296_v23 = vand.u32 2147483648, %v230_v5  ;;  %v294_v26 = vand.u32 2147483647, %v230_v5 }
 0x204   :  { %vm290_vm5 = vweird.f32 %v230_v5  ;;  %v339_v42 = vor.u32 1.1754944e-38, %v338_v29  ;;  %vm337_vm9 = vcmp.eq.f32.partialorder %v336_v32, 8.507059e+37 }
 0x205   :  { %v417_v9 = vpop.f32.mrf.mxu1  ;;  %v297_v35 = vor.u32 1.1754944e-38, %v296_v23  ;;  %v302_v36 = vmul.f32 %v973_v10, %v301_v22  ;;  %vm295_vm8 = vcmp.eq.f32.partialorder %v294_v26, 8.507059e+37 }
 0x206   :  { %v423_v11 = vmul.f32 %v417_v9, %v284_v8 }
 0x207   :  { %v303_v49 = vadd.f32 %v973_v10, %v302_v36 }
 0x208   :  { %v813_v12 = vpop.eup %812  ;;  %427 = vrot.lane.b32.xlu2 %v423_v11, %s848_s23 }
 0x209   :  { %v815_v13 = vpop.eup %814  ;;  %v328_v15 = vmul.f32 %v813_v12, %v239_v4  ;;  %v978_v16 = vpop.xlane.xlu0 %235  ;;  %vm333_vm1 = vweird.f32 %v813_v12  ;;  %v307_v53 = vsel %vm306_vm12, %v973_v10, %v303_v49  ;;  %v31_v49 = vld [vmem:[%s1070_s2 + $0x28] sm:$0xff] }
 0x20a   :  { %v286_v17 = vmul.f32 %v815_v13, %v230_v5  ;;  %816 = vrcp.f32 %v978_v16  ;;  %v981_v18 = vpop.xlane.xlu2 %241  ;;  %vm291_vm2 = vweird.f32 %v815_v13  ;;  %vm986_vm6 = vmor %vm332_vm3, %vm333_vm1  ;;  %v312_v57 = vsel %vm309_vm13, %v311_v56, %v307_v53  ;;  %v790_v53 = vld [vmem:[%s1070_s2 + $0x10] ss:$0 sm:$0xff] }
 0x20b   :  { %v329_v19 = vsub.f32 1.0, %v328_v15  ;;  %818 = vrcp.f32 %v981_v18  ;;  %vm292_vm7 = vmor %vm290_vm5, %vm291_vm2  ;;  %v352_v62 = vand.u32 2147483648, %v981_v18  ;;  %vm318_vm1 = vweird.f32 %v978_v16 }
 0x20c   :  { %v287_v20 = vsub.f32 1.0, %v286_v17  ;;  %v324_v63 = vand.u32 2147483648, %v978_v16  ;;  %vm346_vm2 = vweird.f32 %v981_v18  ;;  %v350_v0 = vand.u32 2147483647, %v981_v18 }
 0x20d   :  { %v330_v24 = vmul.f32 %v813_v12, %v329_v19  ;;  %v322_v1 = vand.u32 2147483647, %v978_v16  ;;  %v353_v4 = vor.u32 1.1754944e-38, %v352_v62 }
 0x20e   :  { %v288_v25 = vmul.f32 %v815_v13, %v287_v20  ;;  %v325_v6 = vor.u32 1.1754944e-38, %v324_v63 }
 0x20f   :  { %v331_v28 = vadd.f32 %v813_v12, %v330_v24 }
 0x210   :  { %v984_v30 = vpop.eup %816  ;;  %v289_v27 = vadd.f32 %v815_v13, %v288_v25 }
 0x211   :  { %v819_v33 = vpop.eup %818  ;;  %v314_v34 = vmul.f32 %v984_v30, %v978_v16  ;;  %v335_v39 = vsel %vm986_vm6, %v813_v12, %v331_v28  ;;  %v420_v41 = vpop.f32.mrf.mxu3  ;;  %vm319_vm14 = vweird.f32 %v984_v30  ;;  %vm351_vm6 = vcmp.eq.f32.partialorder %v350_v0, 8.507059e+37  ;;  %v29_v0 = vld [vmem:[%s1070_s2 + $0x18] sm:$0x1] }
 0x212   :  { %v342_v37 = vmul.f32 %v819_v33, %v981_v18  ;;  %v293_v38 = vsel %vm292_vm7, %v815_v13, %v289_v27  ;;  %v340_v47 = vsel %vm337_vm9, %v339_v42, %v335_v39  ;;  %vm347_vm15 = vweird.f32 %v819_v33  ;;  %vm320_vm3 = vmor %vm318_vm1, %vm319_vm14  ;;  %v37_v42 = vld [vmem:[%s1070_s2 + $0x58] sm:$0xff] }
 0x213   :  { %v298_v40 = vsel %vm295_vm8, %v297_v35, %v293_v38  ;;  %v315_v44 = vsub.f32 1.0, %v314_v34  ;;  %vm348_vm5 = vmor %vm346_vm2, %vm347_vm15  ;;  %vm323_vm7 = vcmp.eq.f32.partialorder %v322_v1, 8.507059e+37  ;;  %vm433_vm1 = vcmask 261248  }
 0x214   :  { %v424_v43 = vmul.f32 %v420_v41, %v298_v40  ;;  %v343_v46 = vsub.f32 1.0, %v342_v37  ;;  %v38_v41 = vld [vmem:[%s1070_s2 + $0x60] sm:$0xff]  ;;  %vm481_vm2 = vcmask 392448  }
 0x215   :  { %v513_v48 = vpop.f32.mrf.mxu0  ;;  %v316_v55 = vmul.f32 %v984_v30, %v315_v44  ;;  %558 = vmatpush.msrb.mxu2 %v38_v41  ;;  %v35_v44 = vld [vmem:[%s1070_s2 + $0x48] sm:$0xff] }
 0x216   :  { %v519_v50 = vmul.f32 %v513_v48, %v340_v47  ;;  %429 = vrot.lane.b32.xlu2 %v424_v43, %s848_s23  ;;  %v344_v54 = vmul.f32 %v819_v33, %v343_v46  ;;  %v36_v43 = vld [vmem:[%s1070_s2 + $0x50] sm:$0xff]  ;;  %v34_v46 = vld [vmem:[%s1070_s2 + $0x40] sm:$0xff]  ;;  %v33_v47 = vld [vmem:[%s1070_s2 + $0x38] sm:$0xff] }
 0x217   :  { %v317_v61 = vadd.f32 %v984_v30, %v316_v55  ;;  %559 = vmatpush.msrb.mxu2 %v37_v42  ;;  %v32_v48 = vld [vmem:[%s1070_s2 + $0x30] sm:$0xff] }
 0x218   :  { %523 = vrot.lane.b32.xlu0 %v519_v50, %s849_s24  ;;  %v345_v60 = vadd.f32 %v819_v33, %v344_v54  ;;  %v851_v50 = vmov 8  }
 0x219   :  { %v321_v3 = vsel %vm320_vm3, %v984_v30, %v317_v61  ;;  %560 = vmatpush.msrb.mxu2 %v36_v43  ;;  %vm529_vm3 = vcmask 523648   ;;  %788 = vset.pattern.permute.xlu2 %v851_v50 }
 0x21a   :  { %v349_v2 = vsel %vm348_vm5, %v819_v33, %v345_v60  ;;  %v326_v8 = vsel %vm323_vm7, %v325_v6, %v321_v3  ;;  %789 = vset.pattern.permute.xlu0 %v851_v50 }
 0x21b   :  { %v354_v7 = vsel %vm351_vm6, %v353_v4, %v349_v2  ;;  %561 = vmatpush.msrb.mxu2 %v35_v44  ;;  %vm543_vm6 = vcmask 523264  }
 0x21c   :  { %v465_v58 = vpop.f32.mrf.mxu1 }
 0x21d   :  { %v471_v59 = vmul.f32 %v465_v58, %v312_v57  ;;  %v516_v5 = vpop.f32.mrf.mxu0  ;;  %562 = vmatpush.msrb.mxu2 %v34_v46 }
 0x21e   :  { %v520_v10 = vmul.f32 %v516_v5, %v354_v7 }
 0x21f   :  { %475 = vrot.lane.b32.xlu1 %v471_v59, %s850_s25  ;;  %563 = vmatpush.msrb.mxu2 %v33_v47 }
 0x221   :  { %564 = vmatpush.msrb.mxu2 %v32_v48 }
 0x223   :  { %565 = vmatpush.msrb.mxu2 %v31_v49 }
 0x224   :  { %v468_v9 = vpop.f32.mrf.mxu1 }
 0x225   :  { %v472_v11 = vmul.f32 %v468_v9, %v326_v8 }
 0x227   :  { %525 = vrot.lane.b32.xlu1 %v520_v10, %s849_s24  ;;  %477 = vrot.lane.b32.xlu0 %v472_v11, %s850_s25 }
 0x22d   :  { %v221_v12 = vpop.xlane.xlu1 %220 }
 0x22e   :  { %820 = vrcp.f32 %v221_v12  ;;  %v254_v16 = vand.u32 2147483648, %v221_v12  ;;  %v252_v18 = vand.u32 2147483647, %v221_v12  ;;  %vm248_vm9 = vweird.f32 %v221_v12 }
 0x230   :  { %v255_v20 = vor.u32 1.1754944e-38, %v254_v16  ;;  %vm253_vm11 = vcmp.eq.f32.partialorder %v252_v18, 8.507059e+37 }
 0x234   :  { %v821_v13 = vpop.eup %820 }
 0x235   :  { %v244_v14 = vmul.f32 %v821_v13, %v221_v12  ;;  %vm249_vm8 = vweird.f32 %v821_v13 }
 0x236   :  { %vm250_vm10 = vmor %vm248_vm9, %vm249_vm8 }
 0x237   :  { %v245_v15 = vsub.f32 1.0, %v244_v14 }
 0x239   :  { %v246_v17 = vmul.f32 %v821_v13, %v245_v15 }
 0x23b   :  { %v247_v19 = vadd.f32 %v821_v13, %v246_v17 }
 0x23c   :  { %v378_v24 = vpop.f32.mrf.mxu2 }
 0x23d   :  { %v251_v22 = vsel %vm250_vm10, %v821_v13, %v247_v19 }
 0x23e   :  { %v256_v23 = vsel %vm253_vm11, %v255_v20, %v251_v22 }
 0x23f   :  { %v384_v25 = vmul.f32 %v378_v24, %v256_v23 }
 0x241   :  { %386 = vst.msk [vmem:[#allocation2] sm:$0xff] %vm170_vm4, %v384_v25 }
 0x244   :  { %v224_v26 = vpop.xlane.xlu0 %223 }
 0x245   :  { %822 = vrcp.f32 %v224_v26  ;;  %v268_v27 = vand.u32 2147483648, %v224_v26  ;;  %v266_v32 = vand.u32 2147483647, %v224_v26  ;;  %vm262_vm13 = vweird.f32 %v224_v26 }
 0x247   :  { %v269_v34 = vor.u32 1.1754944e-38, %v268_v27  ;;  %vm267_vm15 = vcmp.eq.f32.partialorder %v266_v32, 8.507059e+37 }
 0x24b   :  { %v823_v28 = vpop.eup %822 }
 0x24c   :  { %v258_v29 = vmul.f32 %v823_v28, %v224_v26  ;;  %vm263_vm12 = vweird.f32 %v823_v28 }
 0x24d   :  { %vm264_vm14 = vmor %vm262_vm13, %vm263_vm12 }
 0x24e   :  { %v259_v30 = vsub.f32 1.0, %v258_v29 }
 0x250   :  { %v260_v31 = vmul.f32 %v823_v28, %v259_v30 }
 0x252   :  { %v261_v33 = vadd.f32 %v823_v28, %v260_v31 }
 0x253   :  { %v381_v37 = vpop.f32.mrf.mxu2 }
 0x254   :  { %v265_v35 = vsel %vm264_vm14, %v823_v28, %v261_v33 }
 0x255   :  { %v270_v36 = vsel %vm267_vm15, %v269_v34, %v265_v35 }
 0x256   :  { %v385_v38 = vmul.f32 %v381_v37, %v270_v36  ;;  %v791_v36 = vld [vmem:[%s1070_s2 + $0x20] ss:$0 sm:$0xff] }
 0x258   :  { %387 = vst.msk [vmem:[#allocation2 + $0x8] sm:$0xff] %vm170_vm4, %v385_v38 }
 0x262   :  { %v428_v39 = vpop.permute.xlu2 %427 }
 0x263   :  { %434 = vst.msk [vmem:[#allocation2] sm:$0xff] %vm433_vm1, %v428_v39 }
 0x270   :  { %v430_v40 = vpop.permute.xlu2 %429 }
 0x271   :  { %435 = vst.msk [vmem:[#allocation2 + $0x8] sm:$0xff] %vm433_vm1, %v430_v40 }
 0x28a   :  { %v524_v51 = vpop.permute.xlu0 %523 }
 0x291   :  { %v476_v52 = vpop.permute.xlu1 %475 }
 0x292   :  { %482 = vst.msk [vmem:[#allocation2] sm:$0xff] %vm481_vm2, %v476_v52 }
 0x293   :  { %530 = vst.msk [vmem:[#allocation2] sm:$0xff] %vm529_vm3, %v524_v51 }
 0x299   :  { %v526_v54 = vpop.permute.xlu1 %525  ;;  %v478_v55 = vpop.permute.xlu0 %477 }
 0x29a   :  { %483 = vst.msk [vmem:[#allocation2 + $0x8] sm:$0xff] %vm481_vm2, %v478_v55  ;;  %v532_v56 = vld [vmem:[#allocation2] sm:$0xff] }
 0x29b   :  { %531 = vst.msk [vmem:[#allocation2 + $0x8] sm:$0xff] %vm529_vm3, %v526_v54  ;;  %v535_v57 = vadd.f32 %v790_v53, %v532_v56 }
 0x29d   :  { %vm537_vm5 = vcmp.gt.f32.partialorder %v535_v57, 0.0  ;;  %v539_v58 = vmul.f32 0.01, %v535_v57 }
 0x29f   :  { %v541_v59 = vsel %vm537_vm5, %v535_v57, %v539_v58 }
 0x2a0   :  { %740 = vmatmul.msk.f32.vlgmr.msrb.gmra.mxu2 %vm543_vm6, %v541_v59 }
 0x2a2   :  { %v533_v60 = vld [vmem:[#allocation2 + $0x8] sm:$0xff] }
 0x2a3   :  { %v536_v61 = vadd.f32 %v790_v53, %v533_v60 }
 0x2a5   :  { %vm538_vm7 = vcmp.gt.f32.partialorder %v536_v61, 0.0  ;;  %v540_v62 = vmul.f32 0.01, %v536_v61 }
 0x2a7   :  { %v542_v63 = vsel %vm538_vm7, %v536_v61, %v540_v62 }
 0x2a8   :  { %741 = vmatmul.msk.f32.gmra.mxu2 %vm543_vm6, %v542_v63  ;;  %742 = vmatpush.xpose.msk.msrb.mxu3 %vm543_vm6, %v542_v63 }
 0x2ac   :  { %743 = vmatpush.xpose.msk.msrb.mxu3 %vm543_vm6, %v541_v59 }
 0x2af   :  { %744 = vmatmul.msk.f32.vlgmr.msrb.gmra.mxu3 %vm543_vm6, %v29_v0 }
 0x323   :  { %v567_v1 = vpop.f32.mrf.mxu2 }
 0x324   :  { %598 = vperm.xlu2 %788, %v567_v1  }
 0x32b   :  { %v570_v2 = vpop.f32.mrf.mxu2 }
 0x32c   :  { %603 = vperm.xlu0 %789, %v570_v2   ;;  %655 = vmatpush.msra.mxu3 %v570_v2 }
 0x32e   :  { %656 = vmatpush.msra.mxu3 %v567_v1 }
 0x332   :  { %v593_v3 = vpop.f32.mrf.mxu3 }
 0x333   :  { %v606_v4 = vperm.slane %v593_v3, 0 }
 0x37e   :  { %v599_v5 = vpop.permute.xlu2 %598 }
 0x37f   :  { %v607_v6 = vadd.f32 %v606_v4, %v599_v5 }
 0x381   :  { %vm609_vm8 = vcmp.gt.f32.partialorder %v607_v6, 0.0  ;;  %v611_v7 = vmul.f32 0.2, %v607_v6 }
 0x383   :  { %v613_v8 = vsel %vm609_vm8, %v607_v6, %v611_v7 }
 0x384   :  { %v615_v9 = vadd.f32 %v613_v8, %v910_v21 }
 0x386   :  { %v617_v10 = vsel %vm170_vm4, %v615_v9, -inf }
 0x387   :  { %618 = vmax.xlane.f32.xlu1 %v617_v10 }
 0x39e   :  { %v604_v11 = vpop.permute.xlu0 %603 }
 0x39f   :  { %v608_v12 = vadd.f32 %v606_v4, %v604_v11 }
 0x3a1   :  { %vm610_vm9 = vcmp.gt.f32.partialorder %v608_v12, 0.0  ;;  %v612_v13 = vmul.f32 0.2, %v608_v12 }
 0x3a3   :  { %v614_v14 = vsel %vm610_vm9, %v608_v12, %v612_v13 }
 0x3a4   :  { %v616_v15 = vadd.f32 %v614_v14, %v925_v45 }
 0x3a6   :  { %v620_v16 = vsel %vm170_vm4, %v616_v15, -inf }
 0x3a7   :  { %621 = vmax.xlane.f32.xlu2 %v620_v16 }
 0x3fa   :  { %v619_v17 = vpop.xlane.xlu1 %618 }
 0x3fb   :  { %v623_v18 = vsub.f32 %v615_v9, %v619_v17 }
 0x3fd   :  { %v625_v19 = vmul.f32 1.442695, %v623_v18 }
 0x3ff   :  { %824 = vpow2.f32 %v625_v19 }
 0x405   :  { %v825_v20 = vpop.eup %824 }
 0x406   :  { %745 = vmatmul.msk.f32.vlgmr.msra.gmra.mxu3 %vm170_vm4, %v825_v20  ;;  %v629_v21 = vsel %vm170_vm4, %v825_v20, 0.0 }
 0x407   :  { %630 = vadd.xlane.f32.xlu0 %v629_v21 }
 0x41a   :  { %v622_v22 = vpop.xlane.xlu2 %621 }
 0x41b   :  { %v624_v23 = vsub.f32 %v616_v15, %v622_v22 }
 0x41d   :  { %v627_v24 = vmul.f32 1.442695, %v624_v23 }
 0x41f   :  { %826 = vpow2.f32 %v627_v24 }
 0x425   :  { %v827_v25 = vpop.eup %826 }
 0x426   :  { %746 = vmatmul.msk.f32.gmra.mxu3 %vm170_vm4, %v827_v25  ;;  %v632_v45 = vsel %vm170_vm4, %v827_v25, 0.0 }
 0x427   :  { %633 = vadd.xlane.f32.xlu1 %v632_v45 }
 0x47a   :  { %v631_v26 = vpop.xlane.xlu0 %630 }
 0x47b   :  { %828 = vrcp.f32 %v631_v26  ;;  %v675_v27 = vand.u32 2147483648, %v631_v26  ;;  %v673_v32 = vand.u32 2147483647, %v631_v26  ;;  %vm669_vm11 = vweird.f32 %v631_v26 }
 0x47d   :  { %v676_v34 = vor.u32 1.1754944e-38, %v675_v27  ;;  %vm674_vm13 = vcmp.eq.f32.partialorder %v673_v32, 8.507059e+37 }
 0x481   :  { %v829_v28 = vpop.eup %828 }
 0x482   :  { %v665_v29 = vmul.f32 %v829_v28, %v631_v26  ;;  %vm670_vm10 = vweird.f32 %v829_v28 }
 0x483   :  { %vm671_vm12 = vmor %vm669_vm11, %vm670_vm10 }
 0x484   :  { %v666_v30 = vsub.f32 1.0, %v665_v29 }
 0x486   :  { %v667_v31 = vmul.f32 %v829_v28, %v666_v30 }
 0x488   :  { %v668_v33 = vadd.f32 %v829_v28, %v667_v31 }
 0x489   :  { %v658_v37 = vpop.f32.mrf.mxu3 }
 0x48a   :  { %v672_v35 = vsel %vm671_vm12, %v829_v28, %v668_v33 }
 0x48b   :  { %v677_v38 = vsel %vm674_vm13, %v676_v34, %v672_v35 }
 0x48c   :  { %v692_v39 = vmul.f32 %v677_v38, %v658_v37 }
 0x48e   :  { %v695_v40 = vadd.f32 %v791_v36, %v692_v39 }
 0x490   :  { %v697_v41 = vsel %vm39_vm0, %v695_v40, -inf }
 0x491   :  { %698 = vmax.xlane.f32.xlu2 %v697_v41 }
 0x49a   :  { %v634_v42 = vpop.xlane.xlu1 %633 }
 0x49b   :  { %830 = vrcp.f32 %v634_v42  ;;  %v689_v47 = vand.u32 2147483648, %v634_v42  ;;  %v687_v49 = vand.u32 2147483647, %v634_v42  ;;  %vm683_vm14 = vweird.f32 %v634_v42 }
 0x49d   :  { %v690_v51 = vor.u32 1.1754944e-38, %v689_v47  ;;  %vm688_vm1 = vcmp.eq.f32.partialorder %v687_v49, 8.507059e+37 }
 0x4a1   :  { %v831_v43 = vpop.eup %830 }
 0x4a2   :  { %v679_v44 = vmul.f32 %v831_v43, %v634_v42  ;;  %vm684_vm4 = vweird.f32 %v831_v43 }
 0x4a3   :  { %vm685_vm15 = vmor %vm683_vm14, %vm684_vm4 }
 0x4a4   :  { %v680_v46 = vsub.f32 1.0, %v679_v44 }
 0x4a6   :  { %v681_v48 = vmul.f32 %v831_v43, %v680_v46 }
 0x4a8   :  { %v682_v50 = vadd.f32 %v831_v43, %v681_v48 }
 0x4a9   :  { %v661_v53 = vpop.f32.mrf.mxu3 }
 0x4aa   :  { %v686_v52 = vsel %vm685_vm15, %v831_v43, %v682_v50 }
 0x4ab   :  { %v691_v54 = vsel %vm688_vm1, %v690_v51, %v686_v52 }
 0x4ac   :  { %v693_v55 = vmul.f32 %v691_v54, %v661_v53 }
 0x4ae   :  { %v696_v56 = vadd.f32 %v791_v36, %v693_v55 }
 0x4b0   :  { %v700_v57 = vsel %vm39_vm0, %v696_v56, -inf }
 0x4b1   :  { %701 = vmax.xlane.f32.xlu1 %v700_v57 }
 0x504   :  { %v699_v58 = vpop.xlane.xlu2 %698 }
 0x505   :  { %v703_v59 = vsub.f32 %v695_v40, %v699_v58 }
 0x507   :  { %v705_v60 = vmul.f32 1.442695, %v703_v59 }
 0x509   :  { %832 = vpow2.f32 %v705_v60 }
 0x50f   :  { %v833_v61 = vpop.eup %832 }
 0x510   :  { %v709_v62 = vsel %vm39_vm0, %v833_v61, 0.0 }
 0x511   :  { %710 = vadd.xlane.f32.xlu2 %v709_v62 }
 0x524   :  { %v702_v63 = vpop.xlane.xlu1 %701 }
 0x525   :  { %v704_v0 = vsub.f32 %v696_v56, %v702_v63 }
 0x527   :  { %v707_v1 = vmul.f32 1.442695, %v704_v0 }
 0x529   :  { %834 = vpow2.f32 %v707_v1 }
 0x52f   :  { %v835_v2 = vpop.eup %834 }
 0x530   :  { %v712_v3 = vsel %vm39_vm0, %v835_v2, 0.0 }
 0x531   :  { %713 = vadd.xlane.f32.xlu0 %v712_v3 }
 0x584   :  { %v711_v4 = vpop.xlane.xlu2 %710 }
 0x585   :  { %836 = vlog2.f32 %v711_v4 }
 0x58b   :  { %v837_v5 = vpop.eup %836 }
 0x58c   :  { %v716_v6 = vmul.f32 0.6931472, %v837_v5 }
 0x58e   :  { %v719_v7 = vsub.f32 %v703_v59, %v716_v6 }
 0x590   :  { %721 = vst.msk [vmem:[%s1073_s3] sm:$0xff] %vm39_vm0, %v719_v7 }
 0x5a4   :  { %v714_v8 = vpop.xlane.xlu0 %713 }
 0x5a5   :  { %838 = vlog2.f32 %v714_v8 }
 0x5ab   :  { %v839_v9 = vpop.eup %838 }
 0x5ac   :  { %v718_v10 = vmul.f32 0.6931472, %v839_v9 }
 0x5ae   :  { %v720_v11 = vsub.f32 %v704_v0, %v718_v10 }
 0x5b0   :  { %722 = vst.msk [vmem:[%s1073_s3 + $0x8] sm:$0xff] %vm39_vm0, %v720_v11 }

</bundles_post_ra>
